<compile_context>
chip_gen: v7x
topology: tpu7x:2x2x1
jax: 0.10.0
libtpu: 0.0.40
codegen_flags: <defaults>
</compile_context>

<pallas_src>
import functools
import math

import jax
import jax.numpy as jnp
from jax.experimental import pallas as pl
from jax.experimental.pallas import tpu as pltpu

LANE = 128
SUBLANE = 8


def _round_up(x, m):
    return (x + m - 1) // m * m


def mlp_kernel(x_ref, w1_ref, b1_ref, w2_ref, b2_ref, w3_ref, b3_ref, o_ref):
    # Entire hot path fused: x @ W1 + b1 -> ReLU -> @ W2 + b2 -> ReLU -> @ W3 + b3.
    x = x_ref[...]
    h1 = jnp.dot(x, w1_ref[...], preferred_element_type=jnp.float32) + b1_ref[...]
    h1 = jnp.maximum(h1, 0.0)
    h2 = jnp.dot(h1, w2_ref[...], preferred_element_type=jnp.float32) + b2_ref[...]
    h2 = jnp.maximum(h2, 0.0)
    out = jnp.dot(h2, w3_ref[...], preferred_element_type=jnp.float32) + b3_ref[...]
    o_ref[...] = out.astype(o_ref.dtype)


@functools.partial(jax.jit, static_argnames=("block_b",))
def mydnn_forward(x, w1, b1, w2, b2, w3, b3, *, block_b=None):
    B, in_dim = x.shape
    h1 = w1.shape[1]
    h2 = w2.shape[1]
    nc = w3.shape[1]

    # Lane-dense padded sizes.
    in_p = _round_up(in_dim, LANE)
    h1_p = _round_up(h1, LANE)
    h2_p = _round_up(h2, LANE)
    nc_p = _round_up(nc, LANE)

    # Batch tile: single step for small batches; capped at 1024 rows so the
    # double-buffered x / out tiles stay a few MiB even on v7x (64 MiB VMEM).
    if block_b is None:
        block_b = min(_round_up(B, SUBLANE), 1024)
    block_b = max(SUBLANE, _round_up(block_b, SUBLANE))
    b_p = _round_up(max(B, 1), block_b)

    # Zero padding (exact: padded weight/bias lanes are 0, padded rows sliced off).
    x_p = jnp.pad(x, ((0, b_p - B), (0, in_p - in_dim)))
    w1_p = jnp.pad(w1, ((0, in_p - in_dim), (0, h1_p - h1)))
    b1_p = jnp.pad(b1, ((0, 0), (0, h1_p - h1)))
    w2_p = jnp.pad(w2, ((0, h1_p - h1), (0, h2_p - h2)))
    b2_p = jnp.pad(b2, ((0, 0), (0, h2_p - h2)))
    w3_p = jnp.pad(w3, ((0, h2_p - h2), (0, nc_p - nc)))
    b3_p = jnp.pad(b3, ((0, 0), (0, nc_p - nc)))

    grid = (b_p // block_b,)
    # Megacore split only pays off with >= 2 real steps.
    semantics = ("parallel",) if grid[0] > 1 else ("arbitrary",)

    out_p = pl.pallas_call(
        mlp_kernel,
        out_shape=jax.ShapeDtypeStruct((b_p, nc_p), jnp.float32),
        grid=grid,
        in_specs=[
            pl.BlockSpec((block_b, in_p), lambda i: (i, 0)),
            pl.BlockSpec((in_p, h1_p), lambda i: (0, 0)),
            pl.BlockSpec((1, h1_p), lambda i: (0, 0)),
            pl.BlockSpec((h1_p, h2_p), lambda i: (0, 0)),
            pl.BlockSpec((1, h2_p), lambda i: (0, 0)),
            pl.BlockSpec((h2_p, nc_p), lambda i: (0, 0)),
            pl.BlockSpec((1, nc_p), lambda i: (0, 0)),
        ],
        out_specs=pl.BlockSpec((block_b, nc_p), lambda i: (i, 0)),
        compiler_params=pltpu.CompilerParams(
            dimension_semantics=semantics,
        ),
    )(x_p, w1_p, b1_p, w2_p, b2_p, w3_p, b3_p)

    return out_p[:B, :nc]


def init_linear_params(key, in_features, out_features):
    # Matches torch.nn.Linear default init: U(-1/sqrt(fan_in), 1/sqrt(fan_in)).
    bound = 1.0 / math.sqrt(in_features)
    kw, kb = jax.random.split(key)
    w = jax.random.uniform(kw, (in_features, out_features), jnp.float32, -bound, bound)
    b = jax.random.uniform(kb, (1, out_features), jnp.float32, -bound, bound)
    return w, b


def reference_forward(x, w1, b1, w2, b2, w3, b3):
    h = jnp.maximum(x @ w1 + b1, 0.0)
    h = jnp.maximum(h @ w2 + b2, 0.0)
    return h @ w3 + b3


if __name__ == "__main__":
    # Shapes implied by the module (Epileptic Seizure Recognition dataset):
    # 178 features per sample, hidden 40 / 20, 5 classes.
    batch = 16
    input_size = 178
    hidden_size1 = 40
    hidden_size2 = 20
    num_classes = 5

    key = jax.random.PRNGKey(0)
    kx, k1, k2, k3 = jax.random.split(key, 4)

    x = jax.random.normal(kx, (batch, input_size), jnp.float32)
    w1, b1 = init_linear_params(k1, input_size, hidden_size1)
    w2, b2 = init_linear_params(k2, hidden_size1, hidden_size2)
    w3, b3 = init_linear_params(k3, hidden_size2, num_classes)

    out = mydnn_forward(x, w1, b1, w2, b2, w3, b3)
    out = jax.block_until_ready(out)

    ref = reference_forward(x, w1, b1, w2, b2, w3, b3)
    assert out.shape == (batch, num_classes)
    assert jnp.allclose(out, ref, atol=1e-4, rtol=1e-4), "mismatch vs JAX reference"

    print("KERNEL_OK")
</pallas_src>

<mosaic_0001>
module attributes {stable_mosaic.version = 11 : i64} {
  func.func @mlp_kernel(%arg0: i32, %arg1: memref<16x256xf32, #tpu.memory_space<vmem>>, %arg2: memref<256x128xf32, #tpu.memory_space<vmem>>, %arg3: memref<1x128xf32, #tpu.memory_space<vmem>>, %arg4: memref<128x128xf32, #tpu.memory_space<vmem>>, %arg5: memref<1x128xf32, #tpu.memory_space<vmem>>, %arg6: memref<128x128xf32, #tpu.memory_space<vmem>>, %arg7: memref<1x128xf32, #tpu.memory_space<vmem>>, %arg8: memref<16x128xf32, #tpu.memory_space<vmem>>) attributes {dimension_semantics = [#tpu.dimension_semantics<arbitrary>], iteration_bounds = array<i64: 1>, scalar_prefetch = 0 : i64, scratch_operands = 0 : i64, tpu.core_type = #tpu.core_type<tc>, window_params = [{transform_indices = @transform_0, window_bounds = array<i64: 16, 256>}, {pipeline_mode = #tpu.pipeline_mode<synchronous>, transform_indices = @transform_1, window_bounds = array<i64: 256, 128>}, {pipeline_mode = #tpu.pipeline_mode<synchronous>, transform_indices = @transform_2, window_bounds = array<i64: 1, 128>}, {pipeline_mode = #tpu.pipeline_mode<synchronous>, transform_indices = @transform_3, window_bounds = array<i64: 128, 128>}, {pipeline_mode = #tpu.pipeline_mode<synchronous>, transform_indices = @transform_4, window_bounds = array<i64: 1, 128>}, {pipeline_mode = #tpu.pipeline_mode<synchronous>, transform_indices = @transform_5, window_bounds = array<i64: 128, 128>}, {pipeline_mode = #tpu.pipeline_mode<synchronous>, transform_indices = @transform_6, window_bounds = array<i64: 1, 128>}, {transform_indices = @transform_7, window_bounds = array<i64: 16, 128>}]} {
    %c0 = arith.constant 0 : index
    %c0_0 = arith.constant 0 : index
    %0 = vector.load %arg1[%c0, %c0_0] : memref<16x256xf32, #tpu.memory_space<vmem>>, vector<16x256xf32>
    %c0_1 = arith.constant 0 : index
    %c0_2 = arith.constant 0 : index
    %1 = vector.load %arg2[%c0_1, %c0_2] : memref<256x128xf32, #tpu.memory_space<vmem>>, vector<256x128xf32>
    %cst = arith.constant dense<0.000000e+00> : vector<16x128xf32>
    %2 = tpu.matmul %0, %1, %cst {dimension_numbers = #tpu.dot_dimension_numbers<[1], [0], [0], [1], [0, 0, 1, 1], [], []>} : vector<16x256xf32>, vector<256x128xf32>, vector<16x128xf32> -> vector<16x128xf32>
    %c0_3 = arith.constant 0 : index
    %c0_4 = arith.constant 0 : index
    %3 = vector.load %arg3[%c0_3, %c0_4] : memref<1x128xf32, #tpu.memory_space<vmem>>, vector<1x128xf32>
    %4 = vector.broadcast %3 : vector<1x128xf32> to vector<16x128xf32>
    %5 = arith.addf %2, %4 : vector<16x128xf32>
    %cst_5 = arith.constant 0.000000e+00 : f32
    %6 = vector.broadcast %cst_5 : f32 to vector<16x128xf32>
    %7 = arith.maximumf %5, %6 : vector<16x128xf32>
    %c0_6 = arith.constant 0 : index
    %c0_7 = arith.constant 0 : index
    %8 = vector.load %arg4[%c0_6, %c0_7] : memref<128x128xf32, #tpu.memory_space<vmem>>, vector<128x128xf32>
    %cst_8 = arith.constant dense<0.000000e+00> : vector<16x128xf32>
    %9 = tpu.matmul %7, %8, %cst_8 {dimension_numbers = #tpu.dot_dimension_numbers<[1], [0], [0], [1], [0, 0, 1, 1], [], []>} : vector<16x128xf32>, vector<128x128xf32>, vector<16x128xf32> -> vector<16x128xf32>
    %c0_9 = arith.constant 0 : index
    %c0_10 = arith.constant 0 : index
    %10 = vector.load %arg5[%c0_9, %c0_10] : memref<1x128xf32, #tpu.memory_space<vmem>>, vector<1x128xf32>
    %11 = vector.broadcast %10 : vector<1x128xf32> to vector<16x128xf32>
    %12 = arith.addf %9, %11 : vector<16x128xf32>
    %cst_11 = arith.constant 0.000000e+00 : f32
    %13 = vector.broadcast %cst_11 : f32 to vector<16x128xf32>
    %14 = arith.maximumf %12, %13 : vector<16x128xf32>
    %c0_12 = arith.constant 0 : index
    %c0_13 = arith.constant 0 : index
    %15 = vector.load %arg6[%c0_12, %c0_13] : memref<128x128xf32, #tpu.memory_space<vmem>>, vector<128x128xf32>
    %cst_14 = arith.constant dense<0.000000e+00> : vector<16x128xf32>
    %16 = tpu.matmul %14, %15, %cst_14 {dimension_numbers = #tpu.dot_dimension_numbers<[1], [0], [0], [1], [0, 0, 1, 1], [], []>} : vector<16x128xf32>, vector<128x128xf32>, vector<16x128xf32> -> vector<16x128xf32>
    %c0_15 = arith.constant 0 : index
    %c0_16 = arith.constant 0 : index
    %17 = vector.load %arg7[%c0_15, %c0_16] : memref<1x128xf32, #tpu.memory_space<vmem>>, vector<1x128xf32>
    %18 = vector.broadcast %17 : vector<1x128xf32> to vector<16x128xf32>
    %19 = arith.addf %16, %18 : vector<16x128xf32>
    %c0_17 = arith.constant 0 : index
    %c0_18 = arith.constant 0 : index
    %20 = vector.load %arg8[%c0_17, %c0_18] : memref<16x128xf32, #tpu.memory_space<vmem>>, vector<16x128xf32>
    tpu.vector_store %arg8[%c0_17, %c0_18], %19 {strides = array<i32>} : memref<16x128xf32, #tpu.memory_space<vmem>>, vector<16x128xf32>,
    return
  }
  func.func @transform_0(%arg0: i32) -> (i32, i32) {
    %c0_i32 = arith.constant 0 : i32
    %c0_i32_0 = arith.constant 0 : i32
    return %arg0, %c0_i32 : i32, i32
  }
  func.func @transform_1(%arg0: i32) -> (i32, i32) {
    %c0_i32 = arith.constant 0 : i32
    %c0_i32_0 = arith.constant 0 : i32
    %c0_i32_1 = arith.constant 0 : i32
    return %c0_i32, %c0_i32_0 : i32, i32
  }
  func.func @transform_2(%arg0: i32) -> (i32, i32) {
    %c0_i32 = arith.constant 0 : i32
    %c0_i32_0 = arith.constant 0 : i32
    %c0_i32_1 = arith.constant 0 : i32
    return %c0_i32, %c0_i32_0 : i32, i32
  }
  func.func @transform_3(%arg0: i32) -> (i32, i32) {
    %c0_i32 = arith.constant 0 : i32
    %c0_i32_0 = arith.constant 0 : i32
    %c0_i32_1 = arith.constant 0 : i32
    return %c0_i32, %c0_i32_0 : i32, i32
  }
  func.func @transform_4(%arg0: i32) -> (i32, i32) {
    %c0_i32 = arith.constant 0 : i32
    %c0_i32_0 = arith.constant 0 : i32
    %c0_i32_1 = arith.constant 0 : i32
    return %c0_i32, %c0_i32_0 : i32, i32
  }
  func.func @transform_5(%arg0: i32) -> (i32, i32) {
    %c0_i32 = arith.constant 0 : i32
    %c0_i32_0 = arith.constant 0 : i32
    %c0_i32_1 = arith.constant 0 : i32
    return %c0_i32, %c0_i32_0 : i32, i32
  }
  func.func @transform_6(%arg0: i32) -> (i32, i32) {
    %c0_i32 = arith.constant 0 : i32
    %c0_i32_0 = arith.constant 0 : i32
    %c0_i32_1 = arith.constant 0 : i32
    return %c0_i32, %c0_i32_0 : i32, i32
  }
  func.func @transform_7(%arg0: i32) -> (i32, i32) {
    %c0_i32 = arith.constant 0 : i32
    %c0_i32_0 = arith.constant 0 : i32
    return %arg0, %c0_i32 : i32, i32
  }
}

</mosaic_0001>

<bundles_post_ra>
// kernel: mydnn_forward.1
= control target key start
LH: loop header
LB: loop body
LE: loop exit
PB: predicated region body
PF: predicated region fallthrough
CT: control target
= control target key end

     0   :  { %s852_s1 = inlined_call_operand.vmem [shape: f32[256,128], index: 1, kind: input, shape index: {}]   ;;  %s853_s0 = inlined_call_operand.vmem [shape: f32[16,256], index: 0, kind: input, shape index: {}]   ;;  %s854_s3 = inlined_call_operand.vmem [shape: f32[128,128], index: 3, kind: input, shape index: {}]   ;;  %s855_s5 = inlined_call_operand.vmem [shape: f32[128,128], index: 5, kind: input, shape index: {}]   ;;  %s856_s2 = inlined_call_operand.vmem [shape: f32[1,128], index: 2, kind: input, shape index: {}]   ;;  %s857_s4 = inlined_call_operand.vmem [shape: f32[1,128], index: 4, kind: input, shape index: {}]   ;;  %s858_s6 = inlined_call_operand.vmem [shape: f32[1,128], index: 6, kind: input, shape index: {}]   ;;  %s859_s7 = inlined_call_operand.vmem [shape: f32[16,128], index: 7, kind: output, shape index: {}]  }
   0x1   :  { %v46_v0 = vld [vmem:[%s852_s1 + $0x80] sm:$0xff]  ;;  %v47_v1 = vld [vmem:[%s852_s1 + $0x88] sm:$0xff]  ;;  %v48_v5 = vld [vmem:[%s852_s1 + $0x90] sm:$0xff] }
   0x2   :  { %v30_v2 = vld [vmem:[%s852_s1] sm:$0xff]  ;;  %v497_v3 = vpack.c.bf16 %v47_v1, %v46_v0  ;;  %v31_v4 = vld [vmem:[%s852_s1 + $0x8] sm:$0xff]  ;;  %v49_v6 = vld [vmem:[%s852_s1 + $0x98] sm:$0xff] }
   0x3   :  { %v499_v7 = vpack.c.bf16 %v31_v4, %v30_v2  ;;  %v501_v8 = vpack.c.bf16 %v49_v6, %v48_v5  ;;  %v32_v9 = vld [vmem:[%s852_s1 + $0x10] sm:$0xff]  ;;  %v33_v10 = vld [vmem:[%s852_s1 + $0x18] sm:$0xff]  ;;  %v50_v11 = vld [vmem:[%s852_s1 + $0xa0] sm:$0xff] }
   0x4   :  { %498 = vmatprep.subr.bf16.mxu0 %v497_v3  ;;  %v51_v12 = vld [vmem:[%s852_s1 + $0xa8] sm:$0xff]  ;;  %v503_v13 = vpack.c.bf16 %v33_v10, %v32_v9  ;;  %v34_v15 = vld [vmem:[%s852_s1 + $0x20] sm:$0xff]  ;;  %v52_v17 = vld [vmem:[%s852_s1 + $0xb0] sm:$0xff] }
   0x5   :  { %500 = vmatpush3.bf16.msra.mxu0 %v499_v7  ;;  %v505_v14 = vpack.c.bf16 %v51_v12, %v50_v11  ;;  %v35_v16 = vld [vmem:[%s852_s1 + $0x28] sm:$0xff]  ;;  %v53_v18 = vld [vmem:[%s852_s1 + $0xb8] sm:$0xff]  ;;  %v36_v21 = vld [vmem:[%s852_s1 + $0x30] sm:$0xff] }
   0x6   :  { %502 = vmatprep.subr.bf16.mxu0 %v501_v8  ;;  %v507_v19 = vpack.c.bf16 %v35_v16, %v34_v15  ;;  %v509_v20 = vpack.c.bf16 %v53_v18, %v52_v17  ;;  %v37_v22 = vld [vmem:[%s852_s1 + $0x38] sm:$0xff]  ;;  %v54_v23 = vld [vmem:[%s852_s1 + $0xc0] sm:$0xff]  ;;  %v55_v24 = vld [vmem:[%s852_s1 + $0xc8] sm:$0xff] }
   0x7   :  { %v27_v25 = vld [vmem:[%s853_s0 + $0x8] sm:$0xff]  ;;  %v38_v26 = vld [vmem:[%s852_s1 + $0x40] sm:$0xff]  ;;  %v511_v27 = vpack.c.bf16 %v37_v22, %v36_v21  ;;  %v148_v30 = vld [vmem:[%s854_s3 + $0x10] sm:$0xff]  ;;  %v513_v31 = vpack.c.bf16 %v55_v24, %v54_v23 }
   0x8   :  { %133 = vmatprep.mubr.f32.mxu0 %v27_v25  ;;  %v146_v28 = vld [vmem:[%s854_s3] sm:$0xff]  ;;  %v147_v29 = vld [vmem:[%s854_s3 + $0x8] sm:$0xff]  ;;  %v56_v33 = vld [vmem:[%s852_s1 + $0xd0] sm:$0xff] }
   0x9   :  { %504 = vmatpush3.bf16.msra.mxu0 %v503_v13  ;;  %v39_v32 = vld [vmem:[%s852_s1 + $0x48] sm:$0xff]  ;;  %v529_v34 = vpack.c.bf16 %v147_v29, %v146_v28  ;;  %v149_v35 = vld [vmem:[%s854_s3 + $0x18] sm:$0xff]  ;;  %v150_v38 = vld [vmem:[%s854_s3 + $0x20] sm:$0xff] }
   0xa   :  { %506 = vmatprep.subr.bf16.mxu0 %v505_v14  ;;  %v57_v36 = vld [vmem:[%s852_s1 + $0xd8] sm:$0xff]  ;;  %v533_v37 = vpack.c.bf16 %v149_v35, %v148_v30  ;;  %v151_v39 = vld [vmem:[%s854_s3 + $0x28] sm:$0xff]  ;;  %v515_v40 = vpack.c.bf16 %v39_v32, %v38_v26  ;;  %v40_v42 = vld [vmem:[%s852_s1 + $0x50] sm:$0xff] }
   0xb   :  { %530 = vmatprep.subr.bf16.mxu1 %v529_v34  ;;  %v517_v41 = vpack.c.bf16 %v57_v36, %v56_v33  ;;  %v41_v43 = vld [vmem:[%s852_s1 + $0x58] sm:$0xff]  ;;  %v58_v44 = vld [vmem:[%s852_s1 + $0xe0] sm:$0xff]  ;;  %v537_v45 = vpack.c.bf16 %v151_v39, %v150_v38  ;;  %v59_v46 = vld [vmem:[%s852_s1 + $0xe8] sm:$0xff] }
   0xc   :  { %532 = vmatpush3.bf16.msra.mxu1 %v529_v34  ;;  %v152_v47 = vld [vmem:[%s854_s3 + $0x30] sm:$0xff]  ;;  %v153_v48 = vld [vmem:[%s854_s3 + $0x38] sm:$0xff]  ;;  %v519_v49 = vpack.c.bf16 %v41_v43, %v40_v42  ;;  %v521_v50 = vpack.c.bf16 %v59_v46, %v58_v44  ;;  %v42_v51 = vld [vmem:[%s852_s1 + $0x60] sm:$0xff] }
   0xd   :  { %508 = vmatpush3.bf16.msra.mxu0 %v507_v19  ;;  %534 = vmatprep.subr.bf16.mxu1 %v533_v37  ;;  %v43_v52 = vld [vmem:[%s852_s1 + $0x68] sm:$0xff]  ;;  %v60_v53 = vld [vmem:[%s852_s1 + $0xf0] sm:$0xff]  ;;  %v541_v54 = vpack.c.bf16 %v153_v48, %v152_v47  ;;  %v61_v55 = vld [vmem:[%s852_s1 + $0xf8] sm:$0xff] }
   0xe   :  { %510 = vmatprep.subr.bf16.mxu0 %v509_v20  ;;  %v154_v56 = vld [vmem:[%s854_s3 + $0x40] sm:$0xff]  ;;  %v155_v57 = vld [vmem:[%s854_s3 + $0x48] sm:$0xff]  ;;  %v523_v58 = vpack.c.bf16 %v43_v52, %v42_v51  ;;  %v525_v59 = vpack.c.bf16 %v61_v55, %v60_v53  ;;  %v44_v60 = vld [vmem:[%s852_s1 + $0x70] sm:$0xff] }
   0xf   :  { %v45_v61 = vld [vmem:[%s852_s1 + $0x78] sm:$0xff]  ;;  %v545_v62 = vpack.c.bf16 %v155_v57, %v154_v56  ;;  %v26_v0 = vld [vmem:[%s853_s0] sm:$0xff]  ;;  %v28_v2 = vld [vmem:[%s853_s0 + $0x10] sm:$0xff] }
  0x10   :  { %536 = vmatpush3.bf16.msra.mxu1 %v533_v37  ;;  %v527_v63 = vpack.c.bf16 %v45_v61, %v44_v60  ;;  %v29_v1 = vld [vmem:[%s853_s0 + $0x18] sm:$0xff]  ;;  %v156_v3 = vld [vmem:[%s854_s3 + $0x50] sm:$0xff]  ;;  %v158_v6 = vld [vmem:[%s854_s3 + $0x60] sm:$0xff] }
  0x11   :  { %512 = vmatpush3.bf16.msra.mxu0 %v511_v27  ;;  %538 = vmatprep.subr.bf16.mxu1 %v537_v45  ;;  %v157_v4 = vld [vmem:[%s854_s3 + $0x58] sm:$0xff]  ;;  %v159_v7 = vld [vmem:[%s854_s3 + $0x68] sm:$0xff]  ;;  %v160_v9 = vld [vmem:[%s854_s3 + $0x70] sm:$0xff] }
  0x12   :  { %514 = vmatprep.subr.bf16.mxu0 %v513_v31  ;;  %v549_v5 = vpack.c.bf16 %v157_v4, %v156_v3  ;;  %v553_v8 = vpack.c.bf16 %v159_v7, %v158_v6  ;;  %v161_v10 = vld [vmem:[%s854_s3 + $0x78] sm:$0xff]  ;;  %v246_v12 = vld [vmem:[%s855_s5] sm:$0xff]  ;;  %v247_v13 = vld [vmem:[%s855_s5 + $0x8] sm:$0xff] }
  0x13   :  { %v557_v11 = vpack.c.bf16 %v161_v10, %v160_v9  ;;  %v248_v14 = vld [vmem:[%s855_s5 + $0x10] sm:$0xff]  ;;  %v561_v15 = vpack.c.bf16 %v247_v13, %v246_v12  ;;  %v249_v16 = vld [vmem:[%s855_s5 + $0x18] sm:$0xff]  ;;  %v250_v18 = vld [vmem:[%s855_s5 + $0x20] sm:$0xff] }
  0x14   :  { %540 = vmatpush3.bf16.msra.mxu1 %v537_v45  ;;  %v565_v17 = vpack.c.bf16 %v249_v16, %v248_v14  ;;  %v251_v19 = vld [vmem:[%s855_s5 + $0x28] sm:$0xff]  ;;  %v252_v21 = vld [vmem:[%s855_s5 + $0x30] sm:$0xff]  ;;  %v253_v22 = vld [vmem:[%s855_s5 + $0x38] sm:$0xff] }
  0x15   :  { %516 = vmatpush3.bf16.msra.mxu0 %v515_v40  ;;  %542 = vmatprep.subr.bf16.mxu1 %v541_v54  ;;  %v569_v20 = vpack.c.bf16 %v251_v19, %v250_v18  ;;  %v573_v23 = vpack.c.bf16 %v253_v22, %v252_v21  ;;  %v254_v24 = vld [vmem:[%s855_s5 + $0x40] sm:$0xff]  ;;  %v255_v25 = vld [vmem:[%s855_s5 + $0x48] sm:$0xff]  ;;  %v256_v27 = vld [vmem:[%s855_s5 + $0x50] sm:$0xff] }
  0x16   :  { %518 = vmatprep.subr.bf16.mxu0 %v517_v41  ;;  %v577_v26 = vpack.c.bf16 %v255_v25, %v254_v24  ;;  %v257_v28 = vld [vmem:[%s855_s5 + $0x58] sm:$0xff]  ;;  %v258_v30 = vld [vmem:[%s855_s5 + $0x60] sm:$0xff]  ;;  %v259_v31 = vld [vmem:[%s855_s5 + $0x68] sm:$0xff] }
  0x17   :  { %v581_v29 = vpack.c.bf16 %v257_v28, %v256_v27  ;;  %v585_v32 = vpack.c.bf16 %v259_v31, %v258_v30  ;;  %v350_v35 = vld [vmem:[%s856_s2] ss:$0 sm:$0xff]  ;;  %v260_v44 = vld [vmem:[%s855_s5 + $0x70] sm:$0xff]  ;;  %v261_v45 = vld [vmem:[%s855_s5 + $0x78] sm:$0xff] }
  0x18   :  { %544 = vmatpush3.bf16.msra.mxu1 %v541_v54  ;;  %v589_v46 = vpack.c.bf16 %v261_v45, %v260_v44  ;;  %v351_v47 = vld [vmem:[%s857_s4] ss:$0 sm:$0xff] }
  0x19   :  { %520 = vmatpush3.bf16.msra.mxu0 %v519_v49  ;;  %546 = vmatprep.subr.bf16.mxu1 %v545_v62  ;;  %v352_v54 = vld [vmem:[%s858_s6] ss:$0 sm:$0xff] }
  0x1a   :  { %522 = vmatprep.subr.bf16.mxu0 %v521_v50 }
  0x1c   :  { %548 = vmatpush3.bf16.msra.mxu1 %v545_v62 }
  0x1d   :  { %524 = vmatpush3.bf16.msra.mxu0 %v523_v58  ;;  %550 = vmatprep.subr.bf16.mxu1 %v549_v5 }
  0x1e   :  { %526 = vmatprep.subr.bf16.mxu0 %v525_v59 }
  0x20   :  { %552 = vmatpush3.bf16.msra.mxu1 %v549_v5 }
  0x21   :  { %528 = vmatpush3.bf16.msra.mxu0 %v527_v63  ;;  %554 = vmatprep.subr.bf16.mxu1 %v553_v8 }
  0x22   :  { %562 = vmatprep.subr.bf16.mxu0 %v561_v15 }
  0x24   :  { %134 = vmatmul.mubr.f32.vlgmr.msra.gmra.mrb[0].mxu0 %v26_v0  ;;  %556 = vmatpush3.bf16.msra.mxu1 %v553_v8 }
  0x25   :  { %138 = vmatprep.mubr.f32.mxu0 %v29_v1  ;;  %558 = vmatprep.subr.bf16.mxu1 %v557_v11 }
  0x26   :  { %564 = vmatpush3.bf16.msra.mxu0 %v561_v15 }
  0x27   :  { %566 = vmatprep.subr.bf16.mxu0 %v565_v17 }
  0x28   :  { %139 = vmatmul.mubr.f32.gmra.mrb[2].mxu0 %v28_v2  ;;  %560 = vmatpush3.bf16.msra.mxu1 %v557_v11 }
  0x2a   :  { %568 = vmatpush3.bf16.msra.mxu0 %v565_v17 }
  0x2b   :  { %570 = vmatprep.subr.bf16.mxu0 %v569_v20 }
  0x2e   :  { %572 = vmatpush3.bf16.msra.mxu0 %v569_v20 }
  0x2f   :  { %574 = vmatprep.subr.bf16.mxu0 %v573_v23 }
  0x32   :  { %576 = vmatpush3.bf16.msra.mxu0 %v573_v23 }
  0x33   :  { %578 = vmatprep.subr.bf16.mxu0 %v577_v26 }
  0x36   :  { %580 = vmatpush3.bf16.msra.mxu0 %v577_v26 }
  0x37   :  { %582 = vmatprep.subr.bf16.mxu0 %v581_v29 }
  0x3a   :  { %584 = vmatpush3.bf16.msra.mxu0 %v581_v29 }
  0x3b   :  { %586 = vmatprep.subr.bf16.mxu0 %v585_v32 }
  0x3e   :  { %588 = vmatpush3.bf16.msra.mxu0 %v585_v32 }
  0x3f   :  { %590 = vmatprep.subr.bf16.mxu0 %v589_v46 }
  0x42   :  { %592 = vmatpush3.bf16.msra.mxu0 %v589_v46 }
  0xf7   :  { %v385_v33 = vpop.f32.mrb[0].mxu0 }
  0xf8   :  { %v386_v34 = vpop.f32.mrb[1].mxu0 }
  0xf9   :  { %v387_v36 = vadd.f32 %v386_v34, %v385_v33 }
  0xfb   :  { %v388_v37 = vpop.f32.mrb[2].mxu0  ;;  %v136_v38 = vadd.f32 %v387_v36, %v350_v35 }
  0xfc   :  { %v389_v39 = vpop.f32.mrb[3].mxu0 }
  0xfd   :  { %v390_v40 = vadd.f32 %v389_v39, %v388_v37  ;;  %v144_v41 = vmax.f32 %v136_v38, 0.0 }
  0xff   :  { %v141_v42 = vadd.f32 %v390_v40, %v350_v35  ;;  %459 = vmatprep.mubr.f32.mxu1 %v144_v41 }
 0x101   :  { %v145_v43 = vmax.f32 %v141_v42, 0.0 }
 0x103   :  { %460 = vmatmul.mubr.f32.vlgmr.msra.gmra.mrb[0].mxu1 %v145_v43 }
 0x1d6   :  { %v461_v48 = vpop.f32.mrb[0].mxu1 }
 0x1d7   :  { %v241_v49 = vadd.f32 %v461_v48, %v351_v47  ;;  %v235_v50 = vpop.f32.mrb[1].mxu1 }
 0x1d8   :  { %v236_v51 = vadd.f32 %v351_v47, %v235_v50 }
 0x1d9   :  { %v245_v53 = vmax.f32 %v241_v49, 0.0 }
 0x1da   :  { %v244_v52 = vmax.f32 %v236_v51, 0.0 }
 0x1dc   :  { %494 = vmatprep.mubr.f32.mxu0 %v244_v52 }
 0x1dd   :  { %495 = vmatmul.mubr.f32.vlgmr.msra.gmra.mrb[4].mxu0 %v245_v53 }
 0x2b0   :  { %v496_v55 = vpop.f32.mrb[4].mxu0 }
 0x2b1   :  { %v341_v56 = vadd.f32 %v496_v55, %v352_v54  ;;  %v335_v57 = vpop.f32.mrb[5].mxu0 }
 0x2b2   :  { %v336_v58 = vadd.f32 %v352_v54, %v335_v57 }
 0x2b3   :  { %345 = vst [vmem:[%s859_s7 + $0x8] sm:$0xff] %v341_v56 }
 0x2b4   :  { %344 = vst [vmem:[%s859_s7] sm:$0xff] %v336_v58 }

</bundles_post_ra>
